<compile_context>
chip_gen: v5e
topology: v5e:2x2
jax: 0.10.0
libtpu: 0.0.40
codegen_flags: <defaults>
</compile_context>

<pallas_src>
import jax
import jax.numpy as jnp
from jax.experimental import pallas as pl
from jax.experimental.pallas import tpu as pltpu


def _round_up(n, m):
    return ((n + m - 1) // m) * m


def _rbf(U, Vt):
    # clamp(1 - ||u_i - v_j||^2, min=0) via ||u||^2 + ||v||^2 - 2 u.v
    # Vt has shape (feat, m) so the dot is a plain MXU matmul (no transposed
    # contraction inside the kernel).
    uu = jnp.sum(U * U, axis=1, keepdims=True)                 # (n, 1)
    vv = jnp.sum(Vt * Vt, axis=0, keepdims=True)               # (1, m)
    uv = jnp.dot(U, Vt, preferred_element_type=jnp.float32)    # (n, m)
    return jnp.maximum(1.0 - (uu + vv - 2.0 * uv), 0.0)


def _mask_weights_kernel(we_ref, ue_ref, vet_ref, wd_ref, ud_ref, vdt_ref,
                         wep_ref, wdp_ref):
    # Mask multiply in f32, cast to the matmul compute dtype at the very end.
    wep_ref[...] = (we_ref[...] * _rbf(ue_ref[...], vet_ref[...])).astype(wep_ref.dtype)
    wdp_ref[...] = (wd_ref[...] * _rbf(ud_ref[...], vdt_ref[...])).astype(wdp_ref.dtype)


def _ae_kernel(x_ref, wep_ref, wdp_ref, be_ref, bd_ref, out_ref):
    # encoder: h = relu(x @ W_e' + b_e)   (f32 accumulation, f32 elementwise)
    x = x_ref[...].astype(wep_ref.dtype)
    h = jnp.dot(x, wep_ref[...], preferred_element_type=jnp.float32) + be_ref[...]
    h = jnp.maximum(h, 0.0)
    # decoder: x_recon = h @ W_d' + b_d
    y = (jnp.dot(h.astype(wdp_ref.dtype), wdp_ref[...],
                 preferred_element_type=jnp.float32) + bd_ref[...])
    out_ref[...] = y.astype(out_ref.dtype)


def glocalk_forward(x, W_e, W_d, b_e, b_d, U_e, V_e, U_d, V_d,
                    *, compute_dtype=jnp.float32, batch_tile=512):
    B, N = x.shape
    H = W_e.shape[1]
    f32 = jnp.float32

    # Lane-dense padding (multiples of 128) + batch-tile padding.
    Np = _round_up(N, 128)
    Hp = _round_up(H, 128)
    TB = min(batch_tile, _round_up(B, 8))
    Bp = _round_up(B, TB)
    num_tiles = Bp // TB

    def pad2(a, r, c):
        return jnp.pad(a.astype(f32), ((0, r - a.shape[0]), (0, c - a.shape[1])))

    x_p = jnp.pad(x, ((0, Bp - B), (0, Np - N)))
    W_e_pad = pad2(W_e, Np, Hp)
    W_d_pad = pad2(W_d, Hp, Np)
    b_e_pad = jnp.pad(b_e.astype(f32), (0, Hp - H)).reshape(1, Hp)
    b_d_pad = jnp.pad(b_d.astype(f32), (0, Np - N)).reshape(1, Np)
    U_e_pad = jnp.pad(U_e.astype(f32), ((0, Np - N), (0, 0)))
    V_e_t = jnp.pad(V_e.astype(f32), ((0, Hp - H), (0, 0))).T   # (feat, Hp)
    U_d_pad = jnp.pad(U_d.astype(f32), ((0, Hp - H), (0, 0)))
    V_d_t = jnp.pad(V_d.astype(f32), ((0, Np - N), (0, 0))).T   # (feat, Np)

    # ---- Stage 1: RBF masks + masked weights, computed exactly once. ----
    vmem = pl.BlockSpec(memory_space=pltpu.MemorySpace.VMEM)
    W_e_m, W_d_m = pl.pallas_call(
        _mask_weights_kernel,
        out_shape=(jax.ShapeDtypeStruct((Np, Hp), compute_dtype),
                   jax.ShapeDtypeStruct((Hp, Np), compute_dtype)),
        in_specs=[vmem] * 6,
        out_specs=(vmem, vmem),
    )(W_e_pad, U_e_pad, V_e_t, W_d_pad, U_d_pad, V_d_t)

    # ---- Stage 2: tiled encoder/decoder over the batch. ----
    x_bytes = jnp.dtype(x.dtype).itemsize
    w_bytes = jnp.dtype(compute_dtype).itemsize
    cost = pl.CostEstimate(
        flops=4 * Bp * Np * Hp,                    # two matmuls, 2*M*N*K each
        transcendentals=0,
        bytes_accessed=(2 * Bp * Np * x_bytes      # x stream + out stream
                        + 2 * Np * Hp * w_bytes    # resident masked weights
                        + (Hp + Np) * 4),          # biases
    )

    out_p = pl.pallas_call(
        _ae_kernel,
        out_shape=jax.ShapeDtypeStruct((Bp, Np), x.dtype),
        grid_spec=pltpu.PrefetchScalarGridSpec(
            num_scalar_prefetch=0,
            grid=(num_tiles,),
            in_specs=[
                pl.BlockSpec((TB, Np), lambda i: (i, 0)),   # x tile (streamed)
                pl.BlockSpec((Np, Hp), lambda i: (0, 0)),   # W_e' (resident)
                pl.BlockSpec((Hp, Np), lambda i: (0, 0)),   # W_d' (resident)
                pl.BlockSpec((1, Hp), lambda i: (0, 0)),    # b_e  (resident)
                pl.BlockSpec((1, Np), lambda i: (0, 0)),    # b_d  (resident)
            ],
            out_specs=pl.BlockSpec((TB, Np), lambda i: (i, 0)),
        ),
        compiler_params=pltpu.CompilerParams(
            dimension_semantics=("parallel",),      # megacore: split batch tiles
            vmem_limit_bytes=64 * 1024 * 1024,      # fits v7x's 64 MiB ceiling
        ),
        cost_estimate=cost,
    )(x_p, W_e_m, W_d_m, b_e_pad, b_d_pad)

    return out_p[:B, :N]


def glocalk_reference(x, W_e, W_d, b_e, b_d, U_e, V_e, U_d, V_d):
    def rbf(U, V):
        diff = U[:, None, :] - V[None, :, :]
        sq = jnp.sum(diff ** 2, axis=2)
        return jnp.maximum(1.0 - sq, 0.0)
    K_e = rbf(U_e, V_e)
    K_d = rbf(U_d, V_d)
    h = jax.nn.relu(x @ (W_e * K_e) + b_e)
    return h @ (W_d * K_d) + b_d


if __name__ == "__main__":
    batch = 8
    num_users = 64
    hidden_dim = 32

    key = jax.random.PRNGKey(0)
    ks = jax.random.split(key, 8)

    # shapes from LocalKernelAE.__init__
    W_e = jax.random.normal(ks[0], (num_users, hidden_dim), jnp.float32)
    W_d = jax.random.normal(ks[1], (hidden_dim, num_users), jnp.float32)
    b_e = jnp.zeros((hidden_dim,), jnp.float32)
    b_d = jnp.zeros((num_users,), jnp.float32)
    U_e = jax.random.normal(ks[2], (num_users, 5), jnp.float32)
    V_e = jax.random.normal(ks[3], (hidden_dim, 5), jnp.float32)
    U_d = jax.random.normal(ks[4], (hidden_dim, 5), jnp.float32)
    V_d = jax.random.normal(ks[5], (num_users, 5), jnp.float32)

    x = jax.random.normal(ks[6], (batch, num_users), jnp.float32)

    # accurate reference (force full-precision matmuls on TPU)
    with jax.default_matmul_precision("highest"):
        ref = glocalk_reference(x, W_e, W_d, b_e, b_d, U_e, V_e, U_d, V_d)
        ref = jax.block_until_ready(ref)

    # f32 kernel path
    out = glocalk_forward(x, W_e, W_d, b_e, b_d, U_e, V_e, U_d, V_d)
    out = jax.block_until_ready(out)
    assert out.shape == (batch, num_users)
    assert jnp.allclose(out, ref, atol=1e-3, rtol=1e-3), "f32 mismatch vs reference"

    # bf16 MXU path (f32 accumulation) — looser tolerance by construction
    out_bf16 = glocalk_forward(x, W_e, W_d, b_e, b_d, U_e, V_e, U_d, V_d,
                               compute_dtype=jnp.bfloat16)
    out_bf16 = jax.block_until_ready(out_bf16)
    assert out_bf16.shape == (batch, num_users)
    assert jnp.allclose(out_bf16, ref, atol=5e-1, rtol=5e-2), "bf16 mismatch vs reference"

    print("KERNEL_OK")
</pallas_src>

<mosaic_0001>
module attributes {stable_mosaic.version = 11 : i64} {
  func.func @_mask_weights_kernel(%arg0: memref<128x128xf32, #tpu.memory_space<vmem>>, %arg1: memref<128x5xf32, #tpu.memory_space<vmem>>, %arg2: memref<5x128xf32, #tpu.memory_space<vmem>>, %arg3: memref<128x128xf32, #tpu.memory_space<vmem>>, %arg4: memref<128x5xf32, #tpu.memory_space<vmem>>, %arg5: memref<5x128xf32, #tpu.memory_space<vmem>>, %arg6: memref<128x128xf32, #tpu.memory_space<vmem>>, %arg7: memref<128x128xf32, #tpu.memory_space<vmem>>) attributes {dimension_semantics = [], scalar_prefetch = 0 : i64, scratch_operands = 0 : i64, tpu.core_type = #tpu.core_type<tc>} {
    %c0 = arith.constant 0 : index
    %c0_0 = arith.constant 0 : index
    %0 = vector.load %arg0[%c0, %c0_0] : memref<128x128xf32, #tpu.memory_space<vmem>>, vector<128x128xf32>
    %c0_1 = arith.constant 0 : index
    %c0_2 = arith.constant 0 : index
    %1 = vector.load %arg1[%c0_1, %c0_2] : memref<128x5xf32, #tpu.memory_space<vmem>>, vector<128x5xf32>
    %c0_3 = arith.constant 0 : index
    %c0_4 = arith.constant 0 : index
    %2 = vector.load %arg2[%c0_3, %c0_4] : memref<5x128xf32, #tpu.memory_space<vmem>>, vector<5x128xf32>
    %3 = arith.mulf %1, %1 : vector<128x5xf32>
    %cst = arith.constant dense<0.000000e+00> : vector<128xf32>
    %4 = vector.multi_reduction <add>, %3, %cst [1] : vector<128x5xf32> to vector<128xf32>
    %5 = vector.shape_cast %4 : vector<128xf32> to vector<128x1xf32>
    %6 = arith.mulf %2, %2 : vector<5x128xf32>
    %cst_5 = arith.constant dense<0.000000e+00> : vector<128xf32>
    %7 = vector.multi_reduction <add>, %6, %cst_5 [0] : vector<5x128xf32> to vector<128xf32>
    %8 = vector.shape_cast %7 : vector<128xf32> to vector<1x128xf32>
    %cst_6 = arith.constant dense<0.000000e+00> : vector<128x128xf32>
    %9 = tpu.matmul %1, %2, %cst_6 {dimension_numbers = #tpu.dot_dimension_numbers<[1], [0], [0], [1], [0, 0, 1, 1], [], []>} : vector<128x5xf32>, vector<5x128xf32>, vector<128x128xf32> -> vector<128x128xf32>
    %10 = vector.broadcast %5 : vector<128x1xf32> to vector<128x128xf32>
    %11 = vector.broadcast %8 : vector<1x128xf32> to vector<128x128xf32>
    %12 = arith.addf %10, %11 : vector<128x128xf32>
    %cst_7 = arith.constant 2.000000e+00 : f32
    %13 = vector.broadcast %cst_7 : f32 to vector<128x128xf32>
    %14 = arith.mulf %13, %9 : vector<128x128xf32>
    %15 = arith.subf %12, %14 : vector<128x128xf32>
    %cst_8 = arith.constant 1.000000e+00 : f32
    %16 = vector.broadcast %cst_8 : f32 to vector<128x128xf32>
    %17 = arith.subf %16, %15 : vector<128x128xf32>
    %cst_9 = arith.constant 0.000000e+00 : f32
    %18 = vector.broadcast %cst_9 : f32 to vector<128x128xf32>
    %19 = arith.maximumf %17, %18 : vector<128x128xf32>
    %20 = arith.mulf %0, %19 : vector<128x128xf32>
    %c0_10 = arith.constant 0 : index
    %c0_11 = arith.constant 0 : index
    %21 = vector.load %arg6[%c0_10, %c0_11] : memref<128x128xf32, #tpu.memory_space<vmem>>, vector<128x128xf32>
    tpu.vector_store %arg6[%c0_10, %c0_11], %20 {strides = array<i32>} : memref<128x128xf32, #tpu.memory_space<vmem>>, vector<128x128xf32>,
    %c0_12 = arith.constant 0 : index
    %c0_13 = arith.constant 0 : index
    %22 = vector.load %arg3[%c0_12, %c0_13] : memref<128x128xf32, #tpu.memory_space<vmem>>, vector<128x128xf32>
    %c0_14 = arith.constant 0 : index
    %c0_15 = arith.constant 0 : index
    %23 = vector.load %arg4[%c0_14, %c0_15] : memref<128x5xf32, #tpu.memory_space<vmem>>, vector<128x5xf32>
    %c0_16 = arith.constant 0 : index
    %c0_17 = arith.constant 0 : index
    %24 = vector.load %arg5[%c0_16, %c0_17] : memref<5x128xf32, #tpu.memory_space<vmem>>, vector<5x128xf32>
    %25 = arith.mulf %23, %23 : vector<128x5xf32>
    %cst_18 = arith.constant dense<0.000000e+00> : vector<128xf32>
    %26 = vector.multi_reduction <add>, %25, %cst_18 [1] : vector<128x5xf32> to vector<128xf32>
    %27 = vector.shape_cast %26 : vector<128xf32> to vector<128x1xf32>
    %28 = arith.mulf %24, %24 : vector<5x128xf32>
    %cst_19 = arith.constant dense<0.000000e+00> : vector<128xf32>
    %29 = vector.multi_reduction <add>, %28, %cst_19 [0] : vector<5x128xf32> to vector<128xf32>
    %30 = vector.shape_cast %29 : vector<128xf32> to vector<1x128xf32>
    %cst_20 = arith.constant dense<0.000000e+00> : vector<128x128xf32>
    %31 = tpu.matmul %23, %24, %cst_20 {dimension_numbers = #tpu.dot_dimension_numbers<[1], [0], [0], [1], [0, 0, 1, 1], [], []>} : vector<128x5xf32>, vector<5x128xf32>, vector<128x128xf32> -> vector<128x128xf32>
    %32 = vector.broadcast %27 : vector<128x1xf32> to vector<128x128xf32>
    %33 = vector.broadcast %30 : vector<1x128xf32> to vector<128x128xf32>
    %34 = arith.addf %32, %33 : vector<128x128xf32>
    %cst_21 = arith.constant 2.000000e+00 : f32
    %35 = vector.broadcast %cst_21 : f32 to vector<128x128xf32>
    %36 = arith.mulf %35, %31 : vector<128x128xf32>
    %37 = arith.subf %34, %36 : vector<128x128xf32>
    %cst_22 = arith.constant 1.000000e+00 : f32
    %38 = vector.broadcast %cst_22 : f32 to vector<128x128xf32>
    %39 = arith.subf %38, %37 : vector<128x128xf32>
    %cst_23 = arith.constant 0.000000e+00 : f32
    %40 = vector.broadcast %cst_23 : f32 to vector<128x128xf32>
    %41 = arith.maximumf %39, %40 : vector<128x128xf32>
    %42 = arith.mulf %22, %41 : vector<128x128xf32>
    %c0_24 = arith.constant 0 : index
    %c0_25 = arith.constant 0 : index
    %43 = vector.load %arg7[%c0_24, %c0_25] : memref<128x128xf32, #tpu.memory_space<vmem>>, vector<128x128xf32>
    tpu.vector_store %arg7[%c0_24, %c0_25], %42 {strides = array<i32>} : memref<128x128xf32, #tpu.memory_space<vmem>>, vector<128x128xf32>,
    return
  }
}

</mosaic_0001>

<bundles_post_ra>
// kernel: tpu_custom_call.1
= control target key start
LH: loop header
LB: loop body
LE: loop exit
PB: predicated region body
PF: predicated region fallthrough
CT: control target
= control target key end

     0   :  { %13 = vsyncpa [#allocation3], 0  ;;  %s1334_s0 = inlined_call_operand.vmem [shape: f32[128,128], index: 0, kind: input, shape index: {}]   ;;  %s1335_s1 = inlined_call_operand.vmem [shape: f32[128,5], index: 1, kind: input, shape index: {}]   ;;  %s1336_s2 = inlined_call_operand.vmem [shape: f32[5,128], index: 2, kind: input, shape index: {}]   ;;  %s1337_s3 = inlined_call_operand.vmem [shape: f32[128,128], index: 3, kind: input, shape index: {}]   ;;  %s1338_s4 = inlined_call_operand.vmem [shape: f32[128,5], index: 4, kind: input, shape index: {}]   ;;  %s1339_s5 = inlined_call_operand.hbm [shape: f32[5,128], index: 5, kind: input, shape index: {}]   ;;  %s1340_s6 = inlined_call_operand.hbm [shape: f32[128,128], index: 6, kind: output, shape index: {0}]   ;;  %s1341_s7 = inlined_call_operand.hbm [shape: f32[128,128], index: 7, kind: output, shape index: {1}]  }
   0x1   :  { %14 = vsyncpa [#allocation4], 0 }
   0x2   :  { %15 = vsyncpa [#allocation7], 0  ;;  %s31_s26 = sshll.u32 %s1339_s5, 4  ;;  %s865_s27 = smov [#allocation2]   ;;  %s32_s26 = int_to_ptr.hbm [resolvable:$true] %s31_s26 }
   0x3   :  { %s33_s28 = sshll.u32 %s865_s27, 4  ;;  %s34_s28 = int_to_ptr.vmem [resolvable:$true] %s33_s28 }
   0x4   :  { %36 = dma.hbm_to_vmem [thread:$0]  %s32_s26, 128, %s34_s28, [#allocation3]  }
   0x5   :  { %859 = dma.done.wait [#allocation3], 128  }
   0x6   :  { %860 = vsyncadd [#allocation3], 4294967168  ;;  %vm140_vm0 = vcmask 1044480   ;;  %vm90_vm1 = vcmask 39936   ;;  %v73_v0 = vld [vmem:[%s1336_s2] sm:$0x1f] }
   0x7   :  { %v408_v1 = vld [vmem:[#allocation2] sm:$0x1f]  ;;  %v139_v3 = vmul.f32 %v73_v0, %v73_v0  ;;  %746 = vmatpush.msk.msra.mxu0 %vm140_vm0, %v73_v0  ;;  %780 = vmatpush.msk.msra.mxu2 %vm140_vm0, %v73_v0  ;;  %v59_v10 = vld [vmem:[%s1335_s1 + $0x10] sm:$0xff]  ;;  %v58_v11 = vld [vmem:[%s1335_s1 + $0x8] sm:$0xff]  ;;  %s866_s17 = smov [#allocation5]   ;;  %s715_s20 = sshll.u32 %s1340_s6, 4  ;;  %s716_s20 = int_to_ptr.hbm [resolvable:$true] %s715_s20 }
   0x8   :  { %v57_v2 = vld [vmem:[%s1335_s1] sm:$0xff]  ;;  %v473_v4 = vmul.f32 %v408_v1, %v408_v1  ;;  %763 = vmatpush.msk.msra.mxu1 %vm140_vm0, %v408_v1  ;;  %v76_v14 = vmul.f32 %v59_v10, %v59_v10  ;;  %v962_v17 = vld [vmem:[%s1335_s1 + $0x28] sm:$0xff]  ;;  %781 = vmatpush.msk.msra.mxu3 %vm140_vm0, %v408_v1  ;;  %v60_v19 = vld [vmem:[%s1335_s1 + $0x18] sm:$0xff]  ;;  %v75_v21 = vmul.f32 %v58_v11, %v58_v11  ;;  %s1305_s18 = sshll.u32 %s866_s17, 4  ;;  %s868_s28 = smov 8   ;;  %s714_s18 = int_to_ptr.vmem [resolvable:$true] %s1305_s18 }
   0x9   :  { %v65_v5 = vld [vmem:[%s1335_s1 + $0x40] sm:$0xff]  ;;  %v74_v8 = vmul.f32 %v57_v2, %v57_v2  ;;  %747 = vmatmul.msk.f32.vlgmr.msra.gmra.mxu0 %vm90_vm1, %v57_v2  ;;  %v945_v12 = vsel %vm140_vm0, %v139_v3, 0.0  ;;  %v79_v22 = vmul.f32 %v962_v17, %v962_v17  ;;  %v77_v23 = vmul.f32 %v60_v19, %v60_v19  ;;  %v66_v24 = vld [vmem:[%s1335_s1 + $0x48] sm:$0xff]  ;;  %v993_v29 = vld [vmem:[%s1335_s1 + $0x30] sm:$0xff]  ;;  %s728_s12 = sshll.u32 %s1341_s7, 4  ;;  %s729_s12 = int_to_ptr.hbm [resolvable:$true] %s728_s12 }
   0xa   :  { %v927_v6 = vld [vmem:[%s1338_s4] sm:$0xff]  ;;  %v948_v13 = vsel %vm140_vm0, %v473_v4, 0.0  ;;  %755 = vmatmul.msk.f32.vlgmr.msra.gmra.mxu2 %vm90_vm1, %v65_v5  ;;  %v97_v20 = vsel %vm90_vm1, %v76_v14, 0.0  ;;  %v980_v25 = vld [vmem:[%s1338_s4 + $0x8] sm:$0xff]  ;;  %v94_v26 = vsel %vm90_vm1, %v75_v21, 0.0  ;;  %v1002_v31 = vld [vmem:[%s1335_s1 + $0x38] sm:$0xff]  ;;  %v80_v32 = vmul.f32 %v993_v29, %v993_v29 }
   0xb   :  { %v932_v7 = vld [vmem:[%s1335_s1 + $0x20] sm:$0xff]  ;;  %764 = vmatmul.msk.f32.vlgmr.msra.gmra.mxu1 %vm90_vm1, %v927_v6  ;;  %v91_v15 = vsel %vm90_vm1, %v74_v8, 0.0  ;;  %98 = vadd.xlane.f32.xlu1 %v97_v20  ;;  %v106_v27 = vsel %vm90_vm1, %v79_v22, 0.0  ;;  %v988_v28 = vld [vmem:[%s1338_s4 + $0x48] sm:$0xff]  ;;  %v100_v30 = vsel %vm90_vm1, %v77_v23, 0.0  ;;  %v82_v33 = vmul.f32 %v65_v5, %v65_v5  ;;  %v67_v35 = vld [vmem:[%s1335_s1 + $0x50] sm:$0xff] }
   0xc   :  { %v78_v9 = vmul.f32 %v932_v7, %v932_v7  ;;  %v957_v16 = vld [vmem:[%s1338_s4 + $0x40] sm:$0xff]  ;;  %92 = vadd.xlane.f32.xlu0 %v91_v15  ;;  %v81_v34 = vmul.f32 %v1002_v31, %v1002_v31  ;;  %v394_v36 = vld [vmem:[%s1338_s4 + $0x10] sm:$0xff]  ;;  %v109_v37 = vsel %vm90_vm1, %v80_v32, 0.0  ;;  %v68_v41 = vld [vmem:[%s1335_s1 + $0x58] sm:$0xff]  ;;  %v83_v42 = vmul.f32 %v66_v24, %v66_v24 }
   0xd   :  { %772 = vmatmul.msk.f32.vlgmr.msra.gmra.mxu3 %vm90_vm1, %v957_v16  ;;  %v115_v38 = vsel %vm90_vm1, %v82_v33, 0.0  ;;  %v1022_v39 = vld [vmem:[%s1338_s4 + $0x50] sm:$0xff]  ;;  %v85_v43 = vmul.f32 %v68_v41, %v68_v41  ;;  %v84_v44 = vmul.f32 %v67_v35, %v67_v35  ;;  %v395_v45 = vld [vmem:[%s1338_s4 + $0x18] sm:$0xff]  ;;  %v69_v48 = vld [vmem:[%s1335_s1 + $0x60] sm:$0xff]  ;;  %v410_v63 = vmul.f32 %v980_v25, %v980_v25 }
   0xe   :  { %v103_v18 = vsel %vm90_vm1, %v78_v9, 0.0  ;;  %v112_v40 = vsel %vm90_vm1, %v81_v34, 0.0  ;;  %v118_v46 = vsel %vm90_vm1, %v83_v42, 0.0  ;;  %v1044_v49 = vld [vmem:[%s1338_s4 + $0x58] sm:$0xff]  ;;  %v71_v51 = vld [vmem:[%s1335_s1 + $0x70] sm:$0xff]  ;;  %v70_v52 = vld [vmem:[%s1335_s1 + $0x68] sm:$0xff]  ;;  %v86_v53 = vmul.f32 %v69_v48, %v69_v48 }
   0xf   :  { %104 = vadd.xlane.f32.xlu2 %v103_v18  ;;  %v124_v47 = vsel %vm90_vm1, %v85_v43, 0.0  ;;  %v121_v50 = vsel %vm90_vm1, %v84_v44, 0.0  ;;  %v88_v54 = vmul.f32 %v71_v51, %v71_v51  ;;  %v87_v55 = vmul.f32 %v70_v52, %v70_v52  ;;  %v396_v56 = vld [vmem:[%s1338_s4 + $0x20] sm:$0xff]  ;;  %v72_v60 = vld [vmem:[%s1335_s1 + $0x78] sm:$0xff]  ;;  %v397_v1 = vld [vmem:[%s1338_s4 + $0x28] sm:$0xff]  ;;  %s869_s1 = smov [#allocation6]  }
  0x10   :  { %v127_v57 = vsel %vm90_vm1, %v86_v53, 0.0  ;;  %v1067_v59 = vld [vmem:[%s1338_s4 + $0x60] sm:$0xff]  ;;  %v89_v62 = vmul.f32 %v72_v60, %v72_v60  ;;  %v409_v0 = vmul.f32 %v927_v6, %v927_v6  ;;  %v428_v3 = vsel %vm90_vm1, %v410_v63, 0.0  ;;  %v405_v4 = vld [vmem:[%s1338_s4 + $0x68] sm:$0xff]  ;;  %v398_v9 = vld [vmem:[%s1338_s4 + $0x30] sm:$0xff]  ;;  %s726_s5 = sshll.u32 %s869_s1, 4  ;;  %s727_s5 = int_to_ptr.vmem [resolvable:$true] %s726_s5 }
  0x11   :  { %748 = vmatmul.msk.f32.gmra.mxu0 %vm90_vm1, %v58_v11  ;;  %v133_v58 = vsel %vm90_vm1, %v88_v54, 0.0  ;;  %v130_v61 = vsel %vm90_vm1, %v87_v55, 0.0  ;;  %v411_v6 = vmul.f32 %v394_v36, %v394_v36  ;;  %v412_v8 = vmul.f32 %v395_v45, %v395_v45  ;;  %v406_v14 = vld [vmem:[%s1338_s4 + $0x70] sm:$0xff]  ;;  %v407_v23 = vld [vmem:[%s1338_s4 + $0x78] sm:$0xff] }
  0x12   :  { %756 = vmatmul.msk.f32.gmra.mxu2 %vm90_vm1, %v66_v24  ;;  %v136_v2 = vsel %vm90_vm1, %v89_v62, 0.0  ;;  %v425_v5 = vsel %vm90_vm1, %v409_v0, 0.0  ;;  %v414_v18 = vmul.f32 %v397_v1, %v397_v1  ;;  %v415_v20 = vmul.f32 %v398_v9, %v398_v9 }
  0x13   :  { %765 = vmatmul.msk.f32.gmra.mxu1 %vm90_vm1, %v980_v25  ;;  %101 = vadd.xlane.f32.xlu1 %v100_v30  ;;  %v434_v15 = vsel %vm90_vm1, %v412_v8, 0.0  ;;  %v417_v25 = vmul.f32 %v957_v16, %v957_v16  ;;  %v420_v32 = vmul.f32 %v1044_v49, %v1044_v49  ;;  %v422_v16 = vmul.f32 %v405_v4, %v405_v4 }
  0x14   :  { %95 = vadd.xlane.f32.xlu0 %v94_v26  ;;  %v440_v21 = vsel %vm90_vm1, %v414_v18, 0.0  ;;  %v443_v24 = vsel %vm90_vm1, %v415_v20, 0.0  ;;  %v419_v26 = vmul.f32 %v1022_v39, %v1022_v39  ;;  %v421_v33 = vmul.f32 %v1067_v59, %v1067_v59 }
  0x15   :  { %773 = vmatmul.msk.f32.gmra.mxu3 %vm90_vm1, %v988_v28  ;;  %v458_v34 = vsel %vm90_vm1, %v420_v32, 0.0 }
  0x16   :  { %v455_v30 = vsel %vm90_vm1, %v419_v26, 0.0 }
  0x17   :  { %107 = vadd.xlane.f32.xlu2 %v106_v27  ;;  %v418_v27 = vmul.f32 %v988_v28, %v988_v28  ;;  %v464_v28 = vsel %vm90_vm1, %v422_v16, 0.0 }
  0x19   :  { %749 = vmatmul.msk.f32.gmra.mxu0 %vm90_vm1, %v59_v10  ;;  %v431_v10 = vsel %vm90_vm1, %v411_v6, 0.0 }
  0x1a   :  { %757 = vmatmul.msk.f32.gmra.mxu2 %vm90_vm1, %v67_v35  ;;  %v461_v35 = vsel %vm90_vm1, %v421_v33, 0.0 }
  0x1b   :  { %766 = vmatmul.msk.f32.gmra.mxu1 %vm90_vm1, %v394_v36  ;;  %113 = vadd.xlane.f32.xlu1 %v112_v40  ;;  %v423_v36 = vmul.f32 %v406_v14, %v406_v14  ;;  %v142_v40 = vrot.slane %v945_v12, 4 }
  0x1c   :  { %110 = vadd.xlane.f32.xlu0 %v109_v37  ;;  %v424_v37 = vmul.f32 %v407_v23, %v407_v23 }
  0x1d   :  { %774 = vmatmul.msk.f32.gmra.mxu3 %vm90_vm1, %v1022_v39 }
  0x1e   :  { %v470_v39 = vsel %vm90_vm1, %v424_v37, 0.0  ;;  %v43_v37 = vld [vmem:[%s1334_s0 + $0x10] sm:$0xff] }
  0x1f   :  { %116 = vadd.xlane.f32.xlu2 %v115_v38  ;;  %v467_v38 = vsel %vm90_vm1, %v423_v36, 0.0 }
  0x21   :  { %750 = vmatmul.msk.f32.gmra.mxu0 %vm90_vm1, %v60_v19 }
  0x22   :  { %758 = vmatmul.msk.f32.gmra.mxu2 %vm90_vm1, %v68_v41  ;;  %v143_v41 = vadd.f32 %v142_v40, %v945_v12 }
  0x23   :  { %767 = vmatmul.msk.f32.gmra.mxu1 %vm90_vm1, %v395_v45  ;;  %122 = vadd.xlane.f32.xlu1 %v121_v50 }
  0x24   :  { %119 = vadd.xlane.f32.xlu0 %v118_v46  ;;  %v144_v42 = vrot.slane %v143_v41, 2 }
  0x25   :  { %775 = vmatmul.msk.f32.gmra.mxu3 %vm90_vm1, %v1044_v49 }
  0x26   :  { %v145_v43 = vadd.f32 %v144_v42, %v143_v41 }
  0x27   :  { %125 = vadd.xlane.f32.xlu2 %v124_v47 }
  0x28   :  { %v146_v45 = vrot.slane %v145_v43, 1 }
  0x29   :  { %751 = vmatmul.msk.f32.gmra.mxu0 %vm90_vm1, %v932_v7  ;;  %v413_v7 = vmul.f32 %v396_v56, %v396_v56 }
  0x2a   :  { %759 = vmatmul.msk.f32.gmra.mxu2 %vm90_vm1, %v69_v48  ;;  %v1145_v48 = vadd.f32 %v146_v45, %v145_v43 }
  0x2b   :  { %768 = vmatmul.msk.f32.gmra.mxu1 %vm90_vm1, %v396_v56  ;;  %131 = vadd.xlane.f32.xlu1 %v130_v61  ;;  %v437_v11 = vsel %vm90_vm1, %v413_v7, 0.0 }
  0x2c   :  { %128 = vadd.xlane.f32.xlu0 %v127_v57  ;;  %v41_v57 = vld [vmem:[%s1334_s0] sm:$0xff] }
  0x2d   :  { %776 = vmatmul.msk.f32.gmra.mxu3 %vm90_vm1, %v1067_v59 }
  0x2f   :  { %134 = vadd.xlane.f32.xlu2 %v133_v58 }
  0x31   :  { %752 = vmatmul.msk.f32.gmra.mxu0 %vm90_vm1, %v962_v17  ;;  %v399_v17 = vld [vmem:[%s1338_s4 + $0x38] sm:$0xff] }
  0x32   :  { %760 = vmatmul.msk.f32.gmra.mxu2 %vm90_vm1, %v70_v52  ;;  %v416_v19 = vmul.f32 %v399_v17, %v399_v17 }
  0x33   :  { %769 = vmatmul.msk.f32.gmra.mxu1 %vm90_vm1, %v397_v1  ;;  %426 = vadd.xlane.f32.xlu1 %v425_v5 }
  0x34   :  { %137 = vadd.xlane.f32.xlu0 %v136_v2  ;;  %v446_v22 = vsel %vm90_vm1, %v416_v19, 0.0 }
  0x35   :  { %777 = vmatmul.msk.f32.gmra.mxu3 %vm90_vm1, %v405_v4  ;;  %v475_v4 = vrot.slane %v948_v13, 4 }
  0x37   :  { %429 = vadd.xlane.f32.xlu2 %v428_v3 }
  0x39   :  { %753 = vmatmul.msk.f32.gmra.mxu0 %vm90_vm1, %v993_v29  ;;  %v449_v29 = vsel %vm90_vm1, %v417_v25, 0.0 }
  0x3a   :  { %761 = vmatmul.msk.f32.gmra.mxu2 %vm90_vm1, %v71_v51 }
  0x3b   :  { %770 = vmatmul.msk.f32.gmra.mxu1 %vm90_vm1, %v398_v9  ;;  %435 = vadd.xlane.f32.xlu1 %v434_v15  ;;  %v42_v15 = vld [vmem:[%s1334_s0 + $0x8] sm:$0xff] }
  0x3c   :  { %432 = vadd.xlane.f32.xlu0 %v431_v10 }
  0x3d   :  { %778 = vmatmul.msk.f32.gmra.mxu3 %vm90_vm1, %v406_v14 }
  0x3f   :  { %438 = vadd.xlane.f32.xlu2 %v437_v11  ;;  %v476_v11 = vadd.f32 %v475_v4, %v948_v13 }
  0x41   :  { %754 = vmatmul.msk.f32.gmra.mxu0 %vm90_vm1, %v1002_v31  ;;  %v452_v31 = vsel %vm90_vm1, %v418_v27, 0.0 }
  0x42   :  { %762 = vmatmul.msk.f32.gmra.mxu2 %vm90_vm1, %v72_v60 }
  0x43   :  { %771 = vmatmul.msk.f32.gmra.mxu1 %vm90_vm1, %v399_v17  ;;  %444 = vadd.xlane.f32.xlu1 %v443_v24  ;;  %v49_v17 = vld [vmem:[%s1334_s0 + $0x40] sm:$0xff] }
  0x44   :  { %441 = vadd.xlane.f32.xlu0 %v440_v21 }
  0x45   :  { %779 = vmatmul.msk.f32.gmra.mxu3 %vm90_vm1, %v407_v23 }
  0x47   :  { %447 = vadd.xlane.f32.xlu2 %v446_v22 }
  0x4b   :  { %453 = vadd.xlane.f32.xlu1 %v452_v31 }
  0x4c   :  { %450 = vadd.xlane.f32.xlu0 %v449_v29 }
  0x4f   :  { %456 = vadd.xlane.f32.xlu2 %v455_v30  ;;  %v477_v30 = vrot.slane %v476_v11, 2 }
  0x51   :  { %v478_v36 = vadd.f32 %v477_v30, %v476_v11 }
  0x53   :  { %462 = vadd.xlane.f32.xlu1 %v461_v35 }
  0x54   :  { %459 = vadd.xlane.f32.xlu0 %v458_v34 }
  0x57   :  { %465 = vadd.xlane.f32.xlu2 %v464_v28 }
  0x5b   :  { %471 = vadd.xlane.f32.xlu1 %v470_v39 }
  0x5c   :  { %468 = vadd.xlane.f32.xlu0 %v467_v38  ;;  %v50_v38 = vld [vmem:[%s1334_s0 + $0x48] sm:$0xff] }
  0x7e   :  { %v99_v47 = vpop.xlane.xlu1 %98 }
  0x7f   :  { %v93_v44 = vpop.xlane.xlu0 %92  ;;  %v266_v24 = vadd.f32 %v1145_v48, %v99_v47 }
  0x80   :  { %v264_v51 = vadd.f32 %v1145_v48, %v93_v44 }
  0x82   :  { %v1143_v46 = vpop.xlane.xlu2 %104 }
  0x86   :  { %v216_v49 = vpop.f32.mrf.mxu0  ;;  %v102_v55 = vpop.xlane.xlu1 %101 }
  0x87   :  { %v96_v50 = vpop.xlane.xlu0 %95  ;;  %v280_v54 = vmul.f32 2.0, %v216_v49  ;;  %v267_v47 = vadd.f32 %v1145_v48, %v102_v55  ;;  %v51_v55 = vld [vmem:[%s1334_s0 + $0x50] sm:$0xff] }
  0x88   :  { %v1148_v52 = vpop.f32.mrf.mxu1  ;;  %v265_v0 = vadd.f32 %v1145_v48, %v96_v50 }
  0x89   :  { %v296_v12 = vsub.f32 %v264_v51, %v280_v54 }
  0x8a   :  { %v1150_v53 = vpop.xlane.xlu2 %107 }
  0x8b   :  { %v312_v56 = vsub.f32 1.0, %v296_v12 }
  0x8d   :  { %v328_v58 = vmax.f32 %v312_v56, 0.0  ;;  %v240_v59 = vpop.f32.mrf.mxu2  ;;  %v479_v56 = vrot.slane %v478_v36, 1 }
  0x8e   :  { %v288_v60 = vmul.f32 2.0, %v240_v59  ;;  %v219_v61 = vpop.f32.mrf.mxu0  ;;  %v1162_v6 = vpop.xlane.xlu1 %113 }
  0x8f   :  { %v1155_v62 = vpop.xlane.xlu0 %110  ;;  %v344_v63 = vmul.f32 %v328_v58, %v41_v57  ;;  %v281_v3 = vmul.f32 2.0, %v219_v61 }
  0x90   :  { %v1158_v1 = vpop.f32.mrf.mxu1  ;;  %v1164_v7 = vpop.f32.mrf.mxu3 }
  0x91   :  { %360 = vst [vmem:[#allocation5] sm:$0xff] %v344_v63  ;;  %v297_v8 = vsub.f32 %v265_v0, %v281_v3  ;;  %v1196_v0 = vadd.f32 %v479_v56, %v478_v36  ;;  %v44_v3 = vld [vmem:[%s1334_s0 + $0x18] sm:$0xff] }
  0x92   :  { %v117_v2 = vpop.xlane.xlu2 %116 }
  0x93   :  { %v272_v5 = vadd.f32 %v1145_v48, %v117_v2  ;;  %v313_v10 = vsub.f32 1.0, %v297_v8 }
  0x95   :  { %v304_v9 = vsub.f32 %v272_v5, %v288_v60  ;;  %v329_v18 = vmax.f32 %v313_v10, 0.0  ;;  %v243_v19 = vpop.f32.mrf.mxu2 }
  0x96   :  { %v289_v21 = vmul.f32 2.0, %v243_v19  ;;  %v222_v22 = vpop.f32.mrf.mxu0  ;;  %v123_v32 = vpop.xlane.xlu1 %122 }
  0x97   :  { %v320_v14 = vsub.f32 1.0, %v304_v9  ;;  %v120_v23 = vpop.xlane.xlu0 %119  ;;  %v345_v25 = vmul.f32 %v329_v18, %v42_v15  ;;  %v282_v27 = vmul.f32 2.0, %v222_v22  ;;  %v274_v42 = vadd.f32 %v1145_v48, %v123_v32 }
  0x98   :  { %v1174_v26 = vpop.f32.mrf.mxu1  ;;  %v273_v29 = vadd.f32 %v1145_v48, %v120_v23  ;;  %v1177_v16 = vpop.f32.mrf.mxu3  ;;  %v268_v15 = vadd.f32 %v1145_v48, %v1143_v46 }
  0x99   :  { %v336_v20 = vmax.f32 %v320_v14, 0.0  ;;  %361 = vst [vmem:[#allocation5 + $0x8] sm:$0xff] %v345_v25  ;;  %v298_v33 = vsub.f32 %v266_v24, %v282_v27 }
  0x9a   :  { %v126_v13 = vpop.xlane.xlu2 %125  ;;  %v305_v34 = vsub.f32 %v273_v29, %v289_v21  ;;  %v614_v21 = vmul.f32 2.0, %v1158_v1 }
  0x9b   :  { %v352_v31 = vmul.f32 %v336_v20, %v49_v17  ;;  %v314_v28 = vsub.f32 1.0, %v298_v33  ;;  %v275_v8 = vadd.f32 %v1145_v48, %v126_v13  ;;  %v613_v13 = vmul.f32 2.0, %v1148_v52  ;;  %v45_v52 = vld [vmem:[%s1334_s0 + $0x20] sm:$0xff] }
  0x9c   :  { %v321_v35 = vsub.f32 1.0, %v305_v34  ;;  %v269_v33 = vadd.f32 %v1145_v48, %v1150_v53  ;;  %v615_v34 = vmul.f32 2.0, %v1174_v26  ;;  %v376_v26 = vld [vmem:[%s1337_s3] sm:$0xff] }
  0x9d   :  { %368 = vst [vmem:[#allocation5 + $0x40] sm:$0xff] %v352_v31  ;;  %v330_v39 = vmax.f32 %v314_v28, 0.0  ;;  %v246_v41 = vpop.f32.mrf.mxu2  ;;  %v52_v31 = vld [vmem:[%s1334_s0 + $0x58] sm:$0xff] }
  0x9e   :  { %v337_v40 = vmax.f32 %v321_v35, 0.0  ;;  %v290_v43 = vmul.f32 2.0, %v246_v41  ;;  %v225_v44 = vpop.f32.mrf.mxu0  ;;  %v1189_v58 = vpop.xlane.xlu1 %131 }
  0x9f   :  { %v129_v45 = vpop.xlane.xlu0 %128  ;;  %v346_v49 = vmul.f32 %v330_v39, %v43_v37  ;;  %v283_v12 = vmul.f32 2.0, %v225_v44 }
  0xa0   :  { %v353_v50 = vmul.f32 %v337_v40, %v50_v38  ;;  %v558_v51 = vpop.f32.mrf.mxu1  ;;  %v306_v57 = vsub.f32 %v274_v42, %v290_v43  ;;  %v1191_v59 = vpop.f32.mrf.mxu3  ;;  %v276_v37 = vadd.f32 %v1145_v48, %v129_v45  ;;  %v377_v38 = vld [vmem:[%s1337_s3 + $0x8] sm:$0xff] }
  0xa1   :  { %362 = vst [vmem:[#allocation5 + $0x10] sm:$0xff] %v346_v49  ;;  %v299_v60 = vsub.f32 %v267_v47, %v283_v12  ;;  %v616_v36 = vmul.f32 2.0, %v558_v51 }
  0xa2   :  { %v1187_v54 = vpop.xlane.xlu2 %134  ;;  %369 = vst [vmem:[#allocation5 + $0x48] sm:$0xff] %v353_v50  ;;  %v322_v61 = vsub.f32 1.0, %v306_v57 }
  0xa3   :  { %v315_v63 = vsub.f32 1.0, %v299_v60 }
  0xa4   :  { %v338_v2 = vmax.f32 %v322_v61, 0.0 }
  0xa5   :  { %v331_v4 = vmax.f32 %v315_v63, 0.0  ;;  %v249_v5 = vpop.f32.mrf.mxu2 }
  0xa6   :  { %v354_v9 = vmul.f32 %v338_v2, %v51_v55  ;;  %v291_v10 = vmul.f32 2.0, %v249_v5  ;;  %v228_v11 = vpop.f32.mrf.mxu0  ;;  %v427_v24 = vpop.xlane.xlu1 %426 }
  0xa7   :  { %v1202_v14 = vpop.xlane.xlu0 %137  ;;  %v347_v17 = vmul.f32 %v331_v4, %v44_v3  ;;  %v284_v20 = vmul.f32 2.0, %v228_v11  ;;  %v597_v27 = vadd.f32 %v1196_v0, %v427_v24  ;;  %v53_v11 = vld [vmem:[%s1334_s0 + $0x60] sm:$0xff] }
  0xa8   :  { %v561_v18 = vpop.f32.mrf.mxu1  ;;  %370 = vst [vmem:[#allocation5 + $0x50] sm:$0xff] %v354_v9  ;;  %v307_v22 = vsub.f32 %v275_v8, %v291_v10  ;;  %v1208_v25 = vpop.f32.mrf.mxu3 }
  0xa9   :  { %363 = vst [vmem:[#allocation5 + $0x18] sm:$0xff] %v347_v17  ;;  %v300_v29 = vsub.f32 %v268_v15, %v284_v20  ;;  %v629_v1 = vsub.f32 %v597_v27, %v613_v13  ;;  %v617_v53 = vmul.f32 2.0, %v561_v18  ;;  %v378_v27 = vld [vmem:[%s1337_s3 + $0x10] sm:$0xff] }
  0xaa   :  { %v430_v19 = vpop.xlane.xlu2 %429  ;;  %v323_v46 = vsub.f32 1.0, %v307_v22  ;;  %v270_v22 = vadd.f32 %v1145_v48, %v1155_v62  ;;  %v379_v62 = vld [vmem:[%s1337_s3 + $0x18] sm:$0xff] }
  0xab   :  { %v598_v23 = vadd.f32 %v1196_v0, %v430_v19  ;;  %v316_v32 = vsub.f32 1.0, %v300_v29  ;;  %v645_v39 = vsub.f32 1.0, %v629_v1 }
  0xac   :  { %v339_v28 = vmax.f32 %v323_v46, 0.0 }
  0xad   :  { %v630_v30 = vsub.f32 %v598_v23, %v614_v21  ;;  %v332_v40 = vmax.f32 %v316_v32, 0.0  ;;  %v252_v41 = vpop.f32.mrf.mxu2  ;;  %v661_v50 = vmax.f32 %v645_v39, 0.0  ;;  %v46_v21 = vld [vmem:[%s1334_s0 + $0x28] sm:$0xff]  ;;  %v380_v23 = vld [vmem:[%s1337_s3 + $0x20] sm:$0xff] }
  0xae   :  { %v355_v42 = vmul.f32 %v339_v28, %v52_v31  ;;  %v292_v44 = vmul.f32 2.0, %v252_v41  ;;  %v231_v47 = vpop.f32.mrf.mxu0  ;;  %v436_v63 = vpop.xlane.xlu1 %435 }
  0xaf   :  { %v646_v35 = vsub.f32 1.0, %v630_v30  ;;  %v433_v49 = vpop.xlane.xlu0 %432  ;;  %v348_v51 = vmul.f32 %v332_v40, %v45_v52  ;;  %v285_v56 = vmul.f32 2.0, %v231_v47  ;;  %v677_v3 = vmul.f32 %v661_v50, %v376_v26  ;;  %v54_v50 = vld [vmem:[%s1334_s0 + $0x68] sm:$0xff] }
  0xb0   :  { %v564_v45 = vpop.f32.mrf.mxu1  ;;  %v599_v57 = vadd.f32 %v1196_v0, %v433_v49  ;;  %371 = vst [vmem:[#allocation5 + $0x58] sm:$0xff] %v355_v42  ;;  %v308_v61 = vsub.f32 %v276_v37, %v292_v44  ;;  %v1230_v2 = vpop.f32.mrf.mxu3  ;;  %v600_v4 = vadd.f32 %v1196_v0, %v436_v63  ;;  %v277_v30 = vadd.f32 %v1145_v48, %v1189_v58 }
  0xb1   :  { %v662_v43 = vmax.f32 %v646_v35, 0.0  ;;  %364 = vst [vmem:[#allocation5 + $0x20] sm:$0xff] %v348_v51  ;;  %v301_v5 = vsub.f32 %v269_v33, %v285_v56  ;;  %v618_v28 = vmul.f32 2.0, %v564_v45  ;;  %v271_v56 = vadd.f32 %v1145_v48, %v1162_v6 }
  0xb2   :  { %v439_v12 = vpop.xlane.xlu2 %438  ;;  %v631_v8 = vsub.f32 %v599_v57, %v615_v34  ;;  %v324_v9 = vsub.f32 1.0, %v308_v61  ;;  %693 = vst [vmem:[#allocation6] sm:$0xff] %v677_v3  ;;  %v632_v15 = vsub.f32 %v600_v4, %v616_v36  ;;  %v621_v57 = vmul.f32 2.0, %v1164_v7 }
  0xb3   :  { %v678_v60 = vmul.f32 %v662_v43, %v377_v38  ;;  %v601_v55 = vadd.f32 %v1196_v0, %v439_v12  ;;  %v317_v17 = vsub.f32 1.0, %v301_v5  ;;  %v278_v63 = vadd.f32 %v1145_v48, %v1187_v54 }
  0xb4   :  { %v647_v18 = vsub.f32 1.0, %v631_v8  ;;  %v340_v19 = vmax.f32 %v324_v9, 0.0  ;;  %v648_v24 = vsub.f32 1.0, %v632_v15  ;;  %v623_v9 = vmul.f32 2.0, %v1191_v59 }
  0xb5   :  { %694 = vst [vmem:[#allocation6 + $0x8] sm:$0xff] %v678_v60  ;;  %v633_v10 = vsub.f32 %v601_v55, %v617_v53  ;;  %v333_v13 = vmax.f32 %v317_v17, 0.0  ;;  %v255_v46 = vpop.f32.mrf.mxu2  ;;  %v622_v60 = vmul.f32 2.0, %v1177_v16  ;;  %v47_v55 = vld [vmem:[%s1334_s0 + $0x30] sm:$0xff] }
  0xb6   :  { %v663_v29 = vmax.f32 %v647_v18, 0.0  ;;  %v356_v31 = vmul.f32 %v340_v19, %v53_v11  ;;  %v293_v32 = vmul.f32 2.0, %v255_v46  ;;  %v234_v33 = vpop.f32.mrf.mxu0  ;;  %v664_v35 = vmax.f32 %v648_v24, 0.0  ;;  %v445_v42 = vpop.xlane.xlu1 %444  ;;  %v382_v16 = vld [vmem:[%s1337_s3 + $0x30] sm:$0xff] }
  0xb7   :  { %v649_v20 = vsub.f32 1.0, %v633_v10  ;;  %v442_v34 = vpop.xlane.xlu0 %441  ;;  %v349_v52 = vmul.f32 %v333_v13, %v46_v21  ;;  %v286_v38 = vmul.f32 2.0, %v234_v33  ;;  %v603_v26 = vadd.f32 %v1196_v0, %v445_v42  ;;  %v381_v10 = vld [vmem:[%s1337_s3 + $0x28] sm:$0xff]  ;;  %v386_v42 = vld [vmem:[%s1337_s3 + $0x50] sm:$0xff] }
  0xb8   :  { %v567_v36 = vpop.f32.mrf.mxu1  ;;  %372 = vst [vmem:[#allocation5 + $0x60] sm:$0xff] %v356_v31  ;;  %v679_v40 = vmul.f32 %v663_v29, %v378_v27  ;;  %v309_v41 = vsub.f32 %v277_v30, %v293_v32  ;;  %v1252_v53 = vpop.f32.mrf.mxu3  ;;  %v680_v43 = vmul.f32 %v664_v35, %v379_v62  ;;  %v602_v47 = vadd.f32 %v1196_v0, %v442_v34 }
  0xb9   :  { %v665_v1 = vmax.f32 %v649_v20, 0.0  ;;  %v619_v58 = vmul.f32 2.0, %v567_v36  ;;  %365 = vst [vmem:[#allocation5 + $0x28] sm:$0xff] %v349_v52  ;;  %v302_v44 = vsub.f32 %v270_v22, %v286_v38  ;;  %v624_v35 = vmul.f32 2.0, %v1208_v25  ;;  %v55_v52 = vld [vmem:[%s1334_s0 + $0x70] sm:$0xff]  ;;  %v383_v36 = vld [vmem:[%s1337_s3 + $0x38] sm:$0xff] }
  0xba   :  { %v448_v37 = vpop.xlane.xlu2 %447  ;;  %v325_v49 = vsub.f32 1.0, %v309_v41  ;;  %696 = vst [vmem:[#allocation6 + $0x18] sm:$0xff] %v680_v43  ;;  %v634_v12 = vsub.f32 %v602_v47, %v618_v28  ;;  %v279_v28 = vadd.f32 %v1145_v48, %v1202_v14  ;;  %v48_v48 = vld [vmem:[%s1334_s0 + $0x38] sm:$0xff]  ;;  %v625_v25 = vmul.f32 2.0, %v1230_v2  ;;  %v385_v2 = vld [vmem:[%s1337_s3 + $0x48] sm:$0xff] }
  0xbb   :  { %v681_v39 = vmul.f32 %v665_v1, %v380_v23  ;;  %v635_v51 = vsub.f32 %v603_v26, %v619_v58  ;;  %v318_v45 = vsub.f32 1.0, %v302_v44  ;;  %695 = vst [vmem:[#allocation6 + $0x10] sm:$0xff] %v679_v40  ;;  %v604_v7 = vadd.f32 %v1196_v0, %v448_v37  ;;  %v384_v44 = vld [vmem:[%s1337_s3 + $0x40] sm:$0xff] }
  0xbc   :  { %v341_v61 = vmax.f32 %v325_v49, 0.0  ;;  %v650_v5 = vsub.f32 1.0, %v634_v12  ;;  %v626_v58 = vmul.f32 2.0, %v1252_v53 }
  0xbd   :  { %697 = vst [vmem:[#allocation6 + $0x20] sm:$0xff] %v681_v39  ;;  %v651_v3 = vsub.f32 1.0, %v635_v51  ;;  %v334_v4 = vmax.f32 %v318_v45, 0.0  ;;  %v258_v8 = vpop.f32.mrf.mxu2 }
  0xbe   :  { %v357_v6 = vmul.f32 %v341_v61, %v54_v50  ;;  %v294_v11 = vmul.f32 2.0, %v258_v8  ;;  %v237_v15 = vpop.f32.mrf.mxu0  ;;  %v666_v19 = vmax.f32 %v650_v5, 0.0  ;;  %v454_v13 = vpop.xlane.xlu1 %453 }
  0xbf   :  { %v451_v54 = vpop.xlane.xlu0 %450  ;;  %v667_v17 = vmax.f32 %v651_v3, 0.0  ;;  %v350_v18 = vmul.f32 %v334_v4, %v47_v55  ;;  %v287_v59 = vmul.f32 2.0, %v237_v15  ;;  %v606_v30 = vadd.f32 %v1196_v0, %v454_v13  ;;  %v388_v13 = vld [vmem:[%s1337_s3 + $0x60] sm:$0xff] }
  0xc0   :  { %v570_v20 = vpop.f32.mrf.mxu1  ;;  %373 = vst [vmem:[#allocation5 + $0x68] sm:$0xff] %v357_v6  ;;  %v310_v22 = vsub.f32 %v278_v63, %v294_v11  ;;  %v605_v27 = vadd.f32 %v1196_v0, %v451_v54  ;;  %v682_v46 = vmul.f32 %v666_v19, %v381_v10  ;;  %v591_v34 = vpop.f32.mrf.mxu3  ;;  %v56_v54 = vld [vmem:[%s1334_s0 + $0x78] sm:$0xff]  ;;  %s867_s0 = smov 128  }
  0xc1   :  { %v620_v23 = vmul.f32 2.0, %v570_v20  ;;  %v683_v29 = vmul.f32 %v667_v17, %v382_v16  ;;  %366 = vst [vmem:[#allocation5 + $0x30] sm:$0xff] %v350_v18  ;;  %v303_v31 = vsub.f32 %v271_v56, %v287_v59  ;;  %v638_v37 = vsub.f32 %v606_v30, %v622_v60  ;;  %v389_v20 = vld [vmem:[%s1337_s3 + $0x68] sm:$0xff]  ;;  %v387_v59 = vld [vmem:[%s1337_s3 + $0x58] sm:$0xff] }
  0xc2   :  { %v457_v21 = vpop.xlane.xlu2 %456  ;;  %v326_v1 = vsub.f32 1.0, %v310_v22  ;;  %v637_v33 = vsub.f32 %v605_v27, %v621_v57  ;;  %698 = vst [vmem:[#allocation6 + $0x28] sm:$0xff] %v682_v46 }
  0xc3   :  { %v607_v24 = vadd.f32 %v1196_v0, %v457_v21  ;;  %v636_v62 = vsub.f32 %v604_v7, %v620_v23  ;;  %699 = vst [vmem:[#allocation6 + $0x30] sm:$0xff] %v683_v29  ;;  %v319_v38 = vsub.f32 1.0, %v303_v31  ;;  %v654_v43 = vsub.f32 1.0, %v638_v37 }
  0xc4   :  { %v342_v39 = vmax.f32 %v326_v1, 0.0  ;;  %v653_v14 = vsub.f32 1.0, %v637_v33  ;;  %v627_v23 = vmul.f32 2.0, %v591_v34 }
  0xc5   :  { %v639_v32 = vsub.f32 %v607_v24, %v623_v9  ;;  %v652_v40 = vsub.f32 1.0, %v636_v62  ;;  %v335_v26 = vmax.f32 %v319_v38, 0.0  ;;  %v261_v47 = vpop.f32.mrf.mxu2  ;;  %v670_v12 = vmax.f32 %v654_v43, 0.0 }
  0xc6   :  { %v358_v49 = vmul.f32 %v342_v39, %v55_v52  ;;  %v669_v45 = vmax.f32 %v653_v14, 0.0  ;;  %v295_v57 = vmul.f32 2.0, %v261_v47  ;;  %v463_v5 = vpop.xlane.xlu1 %462  ;;  %v391_v39 = vld [vmem:[%s1337_s3 + $0x78] sm:$0xff] }
  0xc7   :  { %v655_v41 = vsub.f32 1.0, %v639_v32  ;;  %v668_v50 = vmax.f32 %v652_v40, 0.0  ;;  %v460_v53 = vpop.xlane.xlu0 %459  ;;  %v351_v56 = vmul.f32 %v335_v26, %v48_v48  ;;  %v686_v8 = vmul.f32 %v670_v12, %v385_v2 }
  0xc8   :  { %v608_v61 = vadd.f32 %v1196_v0, %v460_v53  ;;  %374 = vst [vmem:[#allocation5 + $0x70] sm:$0xff] %v358_v49  ;;  %v685_v3 = vmul.f32 %v669_v45, %v384_v44  ;;  %v311_v9 = vsub.f32 %v279_v28, %v295_v57  ;;  %v609_v6 = vadd.f32 %v1196_v0, %v463_v5  ;;  %v594_v18 = vpop.f32.mrf.mxu3 }
  0xc9   :  { %v671_v51 = vmax.f32 %v655_v41, 0.0  ;;  %v684_v55 = vmul.f32 %v668_v50, %v383_v36  ;;  %367 = vst [vmem:[#allocation5 + $0x38] sm:$0xff] %v351_v56  ;;  %v628_v30 = vmul.f32 2.0, %v594_v18  ;;  %v390_v36 = vld [vmem:[%s1337_s3 + $0x70] sm:$0xff] }
  0xca   :  { %v466_v60 = vpop.xlane.xlu2 %465  ;;  %v640_v7 = vsub.f32 %v608_v61, %v624_v35  ;;  %v327_v10 = vsub.f32 1.0, %v311_v9  ;;  %v641_v11 = vsub.f32 %v609_v6, %v625_v25  ;;  %702 = vst [vmem:[#allocation6 + $0x48] sm:$0xff] %v686_v8 }
  0xcb   :  { %v687_v63 = vmul.f32 %v671_v51, %v386_v42  ;;  %v610_v4 = vadd.f32 %v1196_v0, %v466_v60  ;;  %700 = vst [vmem:[#allocation6 + $0x38] sm:$0xff] %v684_v55 }
  0xcc   :  { %v656_v15 = vsub.f32 1.0, %v640_v7  ;;  %701 = vst [vmem:[#allocation6 + $0x40] sm:$0xff] %v685_v3  ;;  %v343_v19 = vmax.f32 %v327_v10, 0.0  ;;  %v657_v21 = vsub.f32 1.0, %v641_v11 }
  0xcd   :  { %v642_v16 = vsub.f32 %v610_v4, %v626_v58  ;;  %703 = vst [vmem:[#allocation6 + $0x50] sm:$0xff] %v687_v63 }
  0xce   :  { %v672_v22 = vmax.f32 %v656_v15, 0.0  ;;  %v359_v29 = vmul.f32 %v343_v19, %v56_v54  ;;  %v673_v46 = vmax.f32 %v657_v21, 0.0  ;;  %v472_v32 = vpop.xlane.xlu1 %471 }
  0xcf   :  { %v658_v17 = vsub.f32 1.0, %v642_v16  ;;  %v469_v27 = vpop.xlane.xlu0 %468  ;;  %v612_v34 = vadd.f32 %v1196_v0, %v472_v32 }
  0xd0   :  { %v611_v31 = vadd.f32 %v1196_v0, %v469_v27  ;;  %v688_v62 = vmul.f32 %v672_v22, %v387_v59  ;;  %375 = vst [vmem:[#allocation5 + $0x78] sm:$0xff] %v359_v29  ;;  %v689_v33 = vmul.f32 %v673_v46, %v388_v13 }
  0xd1   :  { %v674_v24 = vmax.f32 %v658_v17, 0.0  ;;  %721 = dma.vmem_to_hbm [thread:$0]  %s714_s18, 2048, %s716_s20, [#allocation4], %s867_s0, %s867_s0, %s868_s28   ;;  %v644_v35 = vsub.f32 %v612_v34, %v628_v30 }
  0xd2   :  { %v643_v28 = vsub.f32 %v611_v31, %v627_v23  ;;  %705 = vst [vmem:[#allocation6 + $0x60] sm:$0xff] %v689_v33 }
  0xd3   :  { %v690_v1 = vmul.f32 %v674_v24, %v389_v20  ;;  %704 = vst [vmem:[#allocation6 + $0x58] sm:$0xff] %v688_v62  ;;  %v660_v37 = vsub.f32 1.0, %v644_v35 }
  0xd4   :  { %v659_v52 = vsub.f32 1.0, %v643_v28 }
  0xd5   :  { %706 = vst [vmem:[#allocation6 + $0x68] sm:$0xff] %v690_v1  ;;  %v676_v0 = vmax.f32 %v660_v37, 0.0 }
  0xd6   :  { %v675_v38 = vmax.f32 %v659_v52, 0.0 }
  0xd7   :  { %v692_v41 = vmul.f32 %v676_v0, %v391_v39 }
  0xd8   :  { %v691_v40 = vmul.f32 %v675_v38, %v390_v36 }
  0xd9   :  { %708 = vst [vmem:[#allocation6 + $0x78] sm:$0xff] %v692_v41 }
  0xda   :  { %707 = vst [vmem:[#allocation6 + $0x70] sm:$0xff] %v691_v40 }
  0xdb   :  { %734 = dma.vmem_to_hbm [thread:$0]  %s727_s5, 2048, %s729_s12, [#allocation7], %s867_s0, %s867_s0, %s868_s28  }
  0xdc   :  { %861 = dma.done.wait [#allocation4], 2048  }
  0xdd   :  { %862 = vsyncadd [#allocation4], 4294965248 }
  0xde   :  { %863 = dma.done.wait [#allocation7], 2048  }
  0xdf   :  { %864 = vsyncadd [#allocation7], 4294965248 }
  0xe0   :  { %743 = vsyncpa [#allocation3], 1 }
  0xe1   :  { %744 = vsyncpa [#allocation4], 1 }
  0xe2   :  { %745 = vsyncpa [#allocation7], 1 }

</bundles_post_ra>
